<compile_context>
chip_gen: v6e
topology: v6e:2x2x1
jax: 0.10.0
libtpu: 0.0.40
codegen_flags: <defaults>
</compile_context>

<pallas_src>
import functools
import math

import jax
import jax.numpy as jnp
from jax import lax
from jax.experimental import pallas as pl
from jax.experimental.pallas import tpu as pltpu


def _round_up(x, m):
    return ((x + m - 1) // m) * m


def _vmem_budget_bytes():
    """Generation-aware scoped-VMEM budget (~75% of physical, with headroom)."""
    try:
        cap = int(pltpu.get_tpu_info().vmem_capacity_bytes)
    except Exception:
        cap = 64 << 20          # conservative: v7x has the smallest VMEM
    return (cap * 3) // 4


def _const_spec(block_shape, index_map, single_buffer):
    """BlockSpec for a constant-index operand; single-buffered when possible."""
    if single_buffer:
        try:
            return pl.BlockSpec(block_shape, index_map,
                                pipeline_mode=pl.Buffered(1))
        except TypeError:
            pass
    return pl.BlockSpec(block_shape, index_map)


# ---------------------------------------------------------------------------
# Kernels
# ---------------------------------------------------------------------------

def _mlp_kernel_resident(x_ref, gamma_ref, beta_ref, w1_ref, b1_ref, w2_ref,
                         b2_ref, o_ref, h1_ref, *, eps):
    """Fused LN -> Linear -> ReLU -> Linear + residual; weights VMEM-resident."""
    x = x_ref[...].astype(jnp.float32)                         # (tm, E)

    # LayerNorm over the embedding dim (f32 math, rsqrt on the EUP slot).
    mean = jnp.mean(x, axis=-1, keepdims=True)
    xc = x - mean
    var = jnp.mean(xc * xc, axis=-1, keepdims=True)
    inv = lax.rsqrt(var + eps)
    h = xc * inv * gamma_ref[...].astype(jnp.float32) \
        + beta_ref[...].astype(jnp.float32)

    # Linear(E, M) + ReLU into explicit VMEM scratch (largest intermediate).
    h1_ref[...] = jnp.maximum(
        jnp.dot(h.astype(w1_ref.dtype), w1_ref[...],
                preferred_element_type=jnp.float32)
        + b1_ref[...].astype(jnp.float32), 0.0)

    # Linear(M, E) + residual.
    h2 = jnp.dot(h1_ref[...].astype(w2_ref.dtype), w2_ref[...],
                 preferred_element_type=jnp.float32) \
        + b2_ref[...].astype(jnp.float32)
    o_ref[...] = (h2 + x).astype(o_ref.dtype)


def _mlp_kernel_hidden_tiled(x_ref, gamma_ref, beta_ref, w1_ref, b1_ref,
                             w2_ref, b2_ref, o_ref, ln_ref, h1_ref, acc_ref,
                             *, eps):
    """Same computation with the hidden dim M tiled as a reduction (last axis).

    ReLU is elementwise over the hidden dim, so per-tile
    relu(x_ln @ W1[:, k] + b1[k]) @ W2[k, :] summed over k is exact."""
    k = pl.program_id(1)

    @pl.when(k == 0)
    def _():
        x = x_ref[...].astype(jnp.float32)
        mean = jnp.mean(x, axis=-1, keepdims=True)
        xc = x - mean
        var = jnp.mean(xc * xc, axis=-1, keepdims=True)
        inv = lax.rsqrt(var + eps)
        ln_ref[...] = xc * inv * gamma_ref[...].astype(jnp.float32) \
            + beta_ref[...].astype(jnp.float32)
        acc_ref[...] = jnp.zeros_like(acc_ref)

    h1_ref[...] = jnp.maximum(
        jnp.dot(ln_ref[...].astype(w1_ref.dtype), w1_ref[...],
                preferred_element_type=jnp.float32)
        + b1_ref[...].astype(jnp.float32), 0.0)
    acc_ref[...] += jnp.dot(h1_ref[...].astype(w2_ref.dtype), w2_ref[...],
                            preferred_element_type=jnp.float32)

    @pl.when(k == pl.num_programs(1) - 1)
    def _():
        o_ref[...] = (acc_ref[...] + b2_ref[...].astype(jnp.float32)
                      + x_ref[...].astype(jnp.float32)).astype(o_ref.dtype)


# ---------------------------------------------------------------------------
# Wrapper
# ---------------------------------------------------------------------------

def mlp_forward(att_output, gamma, beta, w1, b1, w2, b2, *, eps=1e-5,
                force_hidden_tile=None):
    """att_output: (..., E); gamma/beta: (E,) or (1, E); w1: (E, M); b1: (M,)
    or (1, M); w2: (M, E); b2: (E,) or (1, E). Returns att_output's shape/dtype."""
    orig_shape = att_output.shape
    E = orig_shape[-1]
    M = w1.shape[1]
    x2d = att_output.reshape(-1, E)
    S = x2d.shape[0]

    gamma = jnp.asarray(gamma).reshape(1, E)
    beta = jnp.asarray(beta).reshape(1, E)
    b1 = jnp.asarray(b1).reshape(1, M)
    b2 = jnp.asarray(b2).reshape(1, E)

    xb = x2d.dtype.itemsize
    wb = w1.dtype.itemsize
    budget = _vmem_budget_bytes()

    # ---- resident weights vs hidden-dim (M) reduction tiling --------------
    resident_w_bytes = (E * M + M * E + M + E) * wb
    use_tiled = (force_hidden_tile is not None) or (resident_w_bytes > budget // 2)
    if use_tiled and force_hidden_tile is None and M % 128 != 0:
        # TODO(synk): pad M to a multiple of 128 to enable hidden-dim tiling.
        use_tiled = False

    if use_tiled:
        if force_hidden_tile is not None:
            tk = int(force_hidden_tile)
        else:
            tk = 128
            for cand in (1024, 512, 256, 128):
                if M % cand == 0 and 2 * (2 * E * cand + cand) * wb <= budget // 3:
                    tk = cand
                    break
        assert M % tk == 0 and tk % 128 == 0, "hidden tile must divide M, lane-aligned"
        per_row = 4 * E * xb + (2 * E + tk) * 4       # x/out dbl-buf + ln/acc/h1 f32
        fixed = 2 * (2 * E * tk + tk) * wb + 8 * E * max(wb, xb)
    else:
        tk = M
        per_row = 4 * E * xb + M * 4                  # x/out dbl-buf + h1 f32
        fixed = 2 * resident_w_bytes + 8 * E * max(wb, xb)

    # ---- row tile: largest that fits; >=2 grid steps when S allows --------
    rem = max(budget - fixed, 1 << 20)
    tm = 8
    for cand in (2048, 1024, 512, 256, 128, 64, 32, 16, 8):
        if cand * per_row <= rem:
            tm = cand
            break
    if S < 8:
        tm = S
    else:
        tm = min(tm, _round_up(S, 8))
        if tm >= S and S >= 16:
            tm = min(tm, _round_up(pl.cdiv(S, 2), 8))   # feed both v7x TCs

    plan = fixed + tm * per_row
    vmem_limit = int(min(budget, max(plan + plan // 4 + (2 << 20), 8 << 20)))

    flops = 4 * S * E * M + 12 * S * E
    bytes_accessed = 2 * S * E * xb + (2 * E * M + M + E) * wb + 4 * E * xb
    cost = pl.CostEstimate(flops=int(flops), transcendentals=int(S),
                           bytes_accessed=int(bytes_accessed))

    # TODO(synk): for production models with E < 128 (demo uses E=32), pad the
    # embedding dim to a lane-dense multiple of 128 to avoid masked stores.

    if use_tiled:
        grid = (pl.cdiv(S, tm), M // tk)
        kernel = functools.partial(_mlp_kernel_hidden_tiled, eps=eps)

        def build(single_buffer):
            in_specs = [
                pl.BlockSpec((tm, E), lambda i, k: (i, 0)),               # x rows
                _const_spec((1, E), lambda i, k: (0, 0), single_buffer),  # gamma
                _const_spec((1, E), lambda i, k: (0, 0), single_buffer),  # beta
                pl.BlockSpec((E, tk), lambda i, k: (0, k)),               # w1 tile
                pl.BlockSpec((1, tk), lambda i, k: (0, k)),               # b1 tile
                pl.BlockSpec((tk, E), lambda i, k: (k, 0)),               # w2 tile
                _const_spec((1, E), lambda i, k: (0, 0), single_buffer),  # b2
            ]
            out_spec = pl.BlockSpec((tm, E), lambda i, k: (i, 0))
            scratch = [pltpu.VMEM((tm, E), jnp.float32),    # normalized x
                       pltpu.VMEM((tm, tk), jnp.float32),   # hidden activation
                       pltpu.VMEM((tm, E), jnp.float32)]    # accumulator
            return pl.pallas_call(
                kernel,
                out_shape=jax.ShapeDtypeStruct((S, E), att_output.dtype),
                grid_spec=pltpu.PrefetchScalarGridSpec(
                    num_scalar_prefetch=0, grid=grid,
                    in_specs=in_specs, out_specs=out_spec,
                    scratch_shapes=scratch),
                compiler_params=pltpu.CompilerParams(
                    dimension_semantics=("parallel", "arbitrary"),
                    vmem_limit_bytes=vmem_limit),
                cost_estimate=cost,
            )
    else:
        grid = (pl.cdiv(S, tm),)
        kernel = functools.partial(_mlp_kernel_resident, eps=eps)

        def build(single_buffer):
            in_specs = [
                pl.BlockSpec((tm, E), lambda i: (i, 0)),                  # x rows
                _const_spec((1, E), lambda i: (0, 0), single_buffer),     # gamma
                _const_spec((1, E), lambda i: (0, 0), single_buffer),     # beta
                _const_spec((E, M), lambda i: (0, 0), single_buffer),     # w1
                _const_spec((1, M), lambda i: (0, 0), single_buffer),     # b1
                _const_spec((M, E), lambda i: (0, 0), single_buffer),     # w2
                _const_spec((1, E), lambda i: (0, 0), single_buffer),     # b2
            ]
            out_spec = pl.BlockSpec((tm, E), lambda i: (i, 0))
            scratch = [pltpu.VMEM((tm, M), jnp.float32)]     # hidden activation
            return pl.pallas_call(
                kernel,
                out_shape=jax.ShapeDtypeStruct((S, E), att_output.dtype),
                grid_spec=pltpu.PrefetchScalarGridSpec(
                    num_scalar_prefetch=0, grid=grid,
                    in_specs=in_specs, out_specs=out_spec,
                    scratch_shapes=scratch),
                compiler_params=pltpu.CompilerParams(
                    dimension_semantics=("parallel",),
                    vmem_limit_bytes=vmem_limit),
                cost_estimate=cost,
            )

    try:
        out2d = build(True)(x2d, gamma, beta, w1, b1, w2, b2)
    except Exception:
        # Fallback: default double-buffering of constant operands.
        out2d = build(False)(x2d, gamma, beta, w1, b1, w2, b2)
    return out2d.reshape(orig_shape)


# ---------------------------------------------------------------------------
# Pure-JAX reference and self-test
# ---------------------------------------------------------------------------

def _reference(x, gamma, beta, w1, b1, w2, b2, eps=1e-5):
    x = x.astype(jnp.float32)
    mean = jnp.mean(x, axis=-1, keepdims=True)
    var = jnp.mean((x - mean) ** 2, axis=-1, keepdims=True)
    h = (x - mean) / jnp.sqrt(var + eps) * gamma.reshape(1, -1) + beta.reshape(1, -1)
    h1 = jnp.maximum(h @ w1 + b1.reshape(1, -1), 0.0)
    return h1 @ w2 + b2.reshape(1, -1) + x


if __name__ == "__main__":
    # ---- Test 1: module-scale shapes, f32, resident-weight path -----------
    E, M, S = 32, 128, 8
    ks = jax.random.split(jax.random.PRNGKey(0), 8)
    x = jax.random.normal(ks[0], (S, E), dtype=jnp.float32)
    b1_bound = 1.0 / math.sqrt(E)
    b2_bound = 1.0 / math.sqrt(M)
    w1 = jax.random.uniform(ks[1], (E, M), minval=-b1_bound, maxval=b1_bound,
                            dtype=jnp.float32)
    b1 = jax.random.uniform(ks[2], (1, M), minval=-b1_bound, maxval=b1_bound,
                            dtype=jnp.float32)
    w2 = jax.random.uniform(ks[3], (M, E), minval=-b2_bound, maxval=b2_bound,
                            dtype=jnp.float32)
    b2 = jax.random.uniform(ks[4], (1, E), minval=-b2_bound, maxval=b2_bound,
                            dtype=jnp.float32)
    gamma = 1.0 + 0.1 * jax.random.normal(ks[5], (1, E), dtype=jnp.float32)
    beta = 0.1 * jax.random.normal(ks[6], (1, E), dtype=jnp.float32)

    out = jax.block_until_ready(mlp_forward(x, gamma, beta, w1, b1, w2, b2))
    ref = _reference(x, gamma, beta, w1, b1, w2, b2)
    assert out.shape == (S, E)
    assert jnp.allclose(out, ref, atol=1e-4, rtol=1e-4), "resident path mismatch"

    # ---- Test 2: lane-dense shapes, bf16 weights, hidden-tiled reduction --
    E2, M2, S2 = 256, 1024, 200
    ks2 = jax.random.split(jax.random.PRNGKey(1), 8)
    x2 = jax.random.normal(ks2[0], (S2, E2), dtype=jnp.float32)
    w1b = jax.random.uniform(ks2[1], (E2, M2), minval=-1 / 16, maxval=1 / 16
                             ).astype(jnp.bfloat16)
    b1b = jax.random.uniform(ks2[2], (1, M2), minval=-1 / 16, maxval=1 / 16
                             ).astype(jnp.bfloat16)
    w2b = jax.random.uniform(ks2[3], (M2, E2), minval=-1 / 32, maxval=1 / 32
                             ).astype(jnp.bfloat16)
    b2b = jax.random.uniform(ks2[4], (1, E2), minval=-1 / 32, maxval=1 / 32
                             ).astype(jnp.bfloat16)
    g2 = 1.0 + 0.1 * jax.random.normal(ks2[5], (1, E2), dtype=jnp.float32)
    bt2 = 0.1 * jax.random.normal(ks2[6], (1, E2), dtype=jnp.float32)

    out2 = jax.block_until_ready(
        mlp_forward(x2, g2, bt2, w1b, b1b, w2b, b2b, force_hidden_tile=256))
    ref2 = _reference(x2, g2, bt2,
                      w1b.astype(jnp.float32), b1b.astype(jnp.float32),
                      w2b.astype(jnp.float32), b2b.astype(jnp.float32))
    assert out2.shape == (S2, E2)
    assert jnp.allclose(out2.astype(jnp.float32), ref2, atol=3e-2, rtol=3e-2), \
        "hidden-tiled / bf16 path mismatch"

    print("KERNEL_OK")
</pallas_src>

<mosaic_0001>
module attributes {stable_mosaic.version = 11 : i64} {
  func.func @_mlp_kernel_resident(%arg0: i32, %arg1: memref<8x32xf32, #tpu.memory_space<vmem>>, %arg2: memref<1x32xf32, #tpu.memory_space<vmem>>, %arg3: memref<1x32xf32, #tpu.memory_space<vmem>>, %arg4: memref<32x128xf32, #tpu.memory_space<vmem>>, %arg5: memref<1x128xf32, #tpu.memory_space<vmem>>, %arg6: memref<128x32xf32, #tpu.memory_space<vmem>>, %arg7: memref<1x32xf32, #tpu.memory_space<vmem>>, %arg8: memref<8x32xf32, #tpu.memory_space<vmem>>, %arg9: memref<8x128xf32, #tpu.memory_space<vmem>>) attributes {dimension_semantics = [#tpu.dimension_semantics<parallel>], iteration_bounds = array<i64: 1>, scalar_prefetch = 0 : i64, scratch_operands = 1 : i64, tpu.core_type = #tpu.core_type<tc>, window_params = [{transform_indices = @transform_0, window_bounds = array<i64: 8, 32>}, {pipeline_mode = #tpu.pipeline_mode<synchronous>, transform_indices = @transform_1, window_bounds = array<i64: 1, 32>}, {pipeline_mode = #tpu.pipeline_mode<synchronous>, transform_indices = @transform_2, window_bounds = array<i64: 1, 32>}, {pipeline_mode = #tpu.pipeline_mode<synchronous>, transform_indices = @transform_3, window_bounds = array<i64: 32, 128>}, {pipeline_mode = #tpu.pipeline_mode<synchronous>, transform_indices = @transform_4, window_bounds = array<i64: 1, 128>}, {pipeline_mode = #tpu.pipeline_mode<synchronous>, transform_indices = @transform_5, window_bounds = array<i64: 128, 32>}, {pipeline_mode = #tpu.pipeline_mode<synchronous>, transform_indices = @transform_6, window_bounds = array<i64: 1, 32>}, {transform_indices = @transform_7, window_bounds = array<i64: 8, 32>}]} {
    %c0 = arith.constant 0 : index
    %c0_0 = arith.constant 0 : index
    %0 = vector.load %arg1[%c0, %c0_0] : memref<8x32xf32, #tpu.memory_space<vmem>>, vector<8x32xf32>
    %cst = arith.constant dense<0.000000e+00> : vector<8xf32>
    %1 = vector.multi_reduction <add>, %0, %cst [1] : vector<8x32xf32> to vector<8xf32>
    %2 = vector.shape_cast %1 : vector<8xf32> to vector<8x1xf32>
    %cst_1 = arith.constant 3.200000e+01 : f32
    %3 = vector.broadcast %cst_1 : f32 to vector<8x1xf32>
    %4 = arith.divf %2, %3 : vector<8x1xf32>
    %5 = vector.broadcast %4 : vector<8x1xf32> to vector<8x32xf32>
    %6 = arith.subf %0, %5 : vector<8x32xf32>
    %7 = arith.mulf %6, %6 : vector<8x32xf32>
    %cst_2 = arith.constant dense<0.000000e+00> : vector<8xf32>
    %8 = vector.multi_reduction <add>, %7, %cst_2 [1] : vector<8x32xf32> to vector<8xf32>
    %9 = vector.shape_cast %8 : vector<8xf32> to vector<8x1xf32>
    %cst_3 = arith.constant 3.200000e+01 : f32
    %10 = vector.broadcast %cst_3 : f32 to vector<8x1xf32>
    %11 = arith.divf %9, %10 : vector<8x1xf32>
    %cst_4 = arith.constant 9.99999974E-6 : f32
    %12 = vector.broadcast %cst_4 : f32 to vector<8x1xf32>
    %13 = arith.addf %11, %12 : vector<8x1xf32>
    %14 = math.rsqrt %13 : vector<8x1xf32>
    %15 = vector.broadcast %14 : vector<8x1xf32> to vector<8x32xf32>
    %16 = arith.mulf %6, %15 : vector<8x32xf32>
    %c0_5 = arith.constant 0 : index
    %c0_6 = arith.constant 0 : index
    %17 = vector.load %arg2[%c0_5, %c0_6] : memref<1x32xf32, #tpu.memory_space<vmem>>, vector<1x32xf32>
    %18 = vector.broadcast %17 : vector<1x32xf32> to vector<8x32xf32>
    %19 = arith.mulf %16, %18 : vector<8x32xf32>
    %c0_7 = arith.constant 0 : index
    %c0_8 = arith.constant 0 : index
    %20 = vector.load %arg3[%c0_7, %c0_8] : memref<1x32xf32, #tpu.memory_space<vmem>>, vector<1x32xf32>
    %21 = vector.broadcast %20 : vector<1x32xf32> to vector<8x32xf32>
    %22 = arith.addf %19, %21 : vector<8x32xf32>
    %c0_9 = arith.constant 0 : index
    %c0_10 = arith.constant 0 : index
    %23 = vector.load %arg4[%c0_9, %c0_10] : memref<32x128xf32, #tpu.memory_space<vmem>>, vector<32x128xf32>
    %cst_11 = arith.constant dense<0.000000e+00> : vector<8x128xf32>
    %24 = tpu.matmul %22, %23, %cst_11 {dimension_numbers = #tpu.dot_dimension_numbers<[1], [0], [0], [1], [0, 0, 1, 1], [], []>} : vector<8x32xf32>, vector<32x128xf32>, vector<8x128xf32> -> vector<8x128xf32>
    %c0_12 = arith.constant 0 : index
    %c0_13 = arith.constant 0 : index
    %25 = vector.load %arg5[%c0_12, %c0_13] : memref<1x128xf32, #tpu.memory_space<vmem>>, vector<1x128xf32>
    %26 = vector.broadcast %25 : vector<1x128xf32> to vector<8x128xf32>
    %27 = arith.addf %24, %26 : vector<8x128xf32>
    %cst_14 = arith.constant 0.000000e+00 : f32
    %28 = vector.broadcast %cst_14 : f32 to vector<8x128xf32>
    %29 = arith.maximumf %27, %28 : vector<8x128xf32>
    %c0_15 = arith.constant 0 : index
    %c0_16 = arith.constant 0 : index
    %30 = vector.load %arg9[%c0_15, %c0_16] : memref<8x128xf32, #tpu.memory_space<vmem>>, vector<8x128xf32>
    tpu.vector_store %arg9[%c0_15, %c0_16], %29 {strides = array<i32>} : memref<8x128xf32, #tpu.memory_space<vmem>>, vector<8x128xf32>,
    %c0_17 = arith.constant 0 : index
    %c0_18 = arith.constant 0 : index
    %31 = vector.load %arg9[%c0_17, %c0_18] : memref<8x128xf32, #tpu.memory_space<vmem>>, vector<8x128xf32>
    %c0_19 = arith.constant 0 : index
    %c0_20 = arith.constant 0 : index
    %32 = vector.load %arg6[%c0_19, %c0_20] : memref<128x32xf32, #tpu.memory_space<vmem>>, vector<128x32xf32>
    %cst_21 = arith.constant dense<0.000000e+00> : vector<8x32xf32>
    %33 = tpu.matmul %31, %32, %cst_21 {dimension_numbers = #tpu.dot_dimension_numbers<[1], [0], [0], [1], [0, 0, 1, 1], [], []>} : vector<8x128xf32>, vector<128x32xf32>, vector<8x32xf32> -> vector<8x32xf32>
    %c0_22 = arith.constant 0 : index
    %c0_23 = arith.constant 0 : index
    %34 = vector.load %arg7[%c0_22, %c0_23] : memref<1x32xf32, #tpu.memory_space<vmem>>, vector<1x32xf32>
    %35 = vector.broadcast %34 : vector<1x32xf32> to vector<8x32xf32>
    %36 = arith.addf %33, %35 : vector<8x32xf32>
    %37 = arith.addf %36, %0 : vector<8x32xf32>
    %c0_24 = arith.constant 0 : index
    %c0_25 = arith.constant 0 : index
    %38 = vector.load %arg8[%c0_24, %c0_25] : memref<8x32xf32, #tpu.memory_space<vmem>>, vector<8x32xf32>
    tpu.vector_store %arg8[%c0_24, %c0_25], %37 {strides = array<i32>} : memref<8x32xf32, #tpu.memory_space<vmem>>, vector<8x32xf32>,
    return
  }
  func.func @transform_0(%arg0: i32) -> (i32, i32) {
    %c0_i32 = arith.constant 0 : i32
    %c0_i32_0 = arith.constant 0 : i32
    return %arg0, %c0_i32 : i32, i32
  }
  func.func @transform_1(%arg0: i32) -> (i32, i32) {
    %c0_i32 = arith.constant 0 : i32
    %c0_i32_0 = arith.constant 0 : i32
    %c0_i32_1 = arith.constant 0 : i32
    return %c0_i32, %c0_i32_0 : i32, i32
  }
  func.func @transform_2(%arg0: i32) -> (i32, i32) {
    %c0_i32 = arith.constant 0 : i32
    %c0_i32_0 = arith.constant 0 : i32
    %c0_i32_1 = arith.constant 0 : i32
    return %c0_i32, %c0_i32_0 : i32, i32
  }
  func.func @transform_3(%arg0: i32) -> (i32, i32) {
    %c0_i32 = arith.constant 0 : i32
    %c0_i32_0 = arith.constant 0 : i32
    %c0_i32_1 = arith.constant 0 : i32
    return %c0_i32, %c0_i32_0 : i32, i32
  }
  func.func @transform_4(%arg0: i32) -> (i32, i32) {
    %c0_i32 = arith.constant 0 : i32
    %c0_i32_0 = arith.constant 0 : i32
    %c0_i32_1 = arith.constant 0 : i32
    return %c0_i32, %c0_i32_0 : i32, i32
  }
  func.func @transform_5(%arg0: i32) -> (i32, i32) {
    %c0_i32 = arith.constant 0 : i32
    %c0_i32_0 = arith.constant 0 : i32
    %c0_i32_1 = arith.constant 0 : i32
    return %c0_i32, %c0_i32_0 : i32, i32
  }
  func.func @transform_6(%arg0: i32) -> (i32, i32) {
    %c0_i32 = arith.constant 0 : i32
    %c0_i32_0 = arith.constant 0 : i32
    %c0_i32_1 = arith.constant 0 : i32
    return %c0_i32, %c0_i32_0 : i32, i32
  }
  func.func @transform_7(%arg0: i32) -> (i32, i32) {
    %c0_i32 = arith.constant 0 : i32
    %c0_i32_0 = arith.constant 0 : i32
    return %arg0, %c0_i32 : i32, i32
  }
}

module attributes {stable_mosaic.version = 11 : i64} {
  func.func @_mlp_kernel_resident(%arg0: i32, %arg1: memref<8x32xf32, #tpu.memory_space<vmem>>, %arg2: memref<1x32xf32, #tpu.memory_space<vmem>>, %arg3: memref<1x32xf32, #tpu.memory_space<vmem>>, %arg4: memref<32x128xf32, #tpu.memory_space<vmem>>, %arg5: memref<1x128xf32, #tpu.memory_space<vmem>>, %arg6: memref<128x32xf32, #tpu.memory_space<vmem>>, %arg7: memref<1x32xf32, #tpu.memory_space<vmem>>, %arg8: memref<8x32xf32, #tpu.memory_space<vmem>>, %arg9: memref<8x128xf32, #tpu.memory_space<vmem>>) attributes {dimension_semantics = [#tpu.dimension_semantics<parallel>], iteration_bounds = array<i64: 1>, scalar_prefetch = 0 : i64, scratch_operands = 1 : i64, tpu.core_type = #tpu.core_type<tc>, window_params = [{transform_indices = @transform_0, window_bounds = array<i64: 8, 32>}, {pipeline_mode = #tpu.pipeline_mode<synchronous>, transform_indices = @transform_1, window_bounds = array<i64: 1, 32>}, {pipeline_mode = #tpu.pipeline_mode<synchronous>, transform_indices = @transform_2, window_bounds = array<i64: 1, 32>}, {pipeline_mode = #tpu.pipeline_mode<synchronous>, transform_indices = @transform_3, window_bounds = array<i64: 32, 128>}, {pipeline_mode = #tpu.pipeline_mode<synchronous>, transform_indices = @transform_4, window_bounds = array<i64: 1, 128>}, {pipeline_mode = #tpu.pipeline_mode<synchronous>, transform_indices = @transform_5, window_bounds = array<i64: 128, 32>}, {pipeline_mode = #tpu.pipeline_mode<synchronous>, transform_indices = @transform_6, window_bounds = array<i64: 1, 32>}, {transform_indices = @transform_7, window_bounds = array<i64: 8, 32>}]} {
    %c0 = arith.constant 0 : index
    %c0_0 = arith.constant 0 : index
    %0 = vector.load %arg1[%c0, %c0_0] : memref<8x32xf32, #tpu.memory_space<vmem>>, vector<8x32xf32>
    %cst = arith.constant dense<0.000000e+00> : vector<8xf32>
    %1 = vector.multi_reduction <add>, %0, %cst [1] : vector<8x32xf32> to vector<8xf32>
    %2 = vector.shape_cast %1 : vector<8xf32> to vector<8x1xf32>
    %cst_1 = arith.constant 3.200000e+01 : f32
    %3 = vector.broadcast %cst_1 : f32 to vector<8x1xf32>
    %4 = arith.divf %2, %3 : vector<8x1xf32>
    %5 = vector.broadcast %4 : vector<8x1xf32> to vector<8x32xf32>
    %6 = arith.subf %0, %5 : vector<8x32xf32>
    %7 = arith.mulf %6, %6 : vector<8x32xf32>
    %cst_2 = arith.constant dense<0.000000e+00> : vector<8xf32>
    %8 = vector.multi_reduction <add>, %7, %cst_2 [1] : vector<8x32xf32> to vector<8xf32>
    %9 = vector.shape_cast %8 : vector<8xf32> to vector<8x1xf32>
    %cst_3 = arith.constant 3.200000e+01 : f32
    %10 = vector.broadcast %cst_3 : f32 to vector<8x1xf32>
    %11 = arith.divf %9, %10 : vector<8x1xf32>
    %cst_4 = arith.constant 9.99999974E-6 : f32
    %12 = vector.broadcast %cst_4 : f32 to vector<8x1xf32>
    %13 = arith.addf %11, %12 : vector<8x1xf32>
    %14 = math.rsqrt %13 : vector<8x1xf32>
    %15 = vector.broadcast %14 : vector<8x1xf32> to vector<8x32xf32>
    %16 = arith.mulf %6, %15 : vector<8x32xf32>
    %c0_5 = arith.constant 0 : index
    %c0_6 = arith.constant 0 : index
    %17 = vector.load %arg2[%c0_5, %c0_6] : memref<1x32xf32, #tpu.memory_space<vmem>>, vector<1x32xf32>
    %18 = vector.broadcast %17 : vector<1x32xf32> to vector<8x32xf32>
    %19 = arith.mulf %16, %18 : vector<8x32xf32>
    %c0_7 = arith.constant 0 : index
    %c0_8 = arith.constant 0 : index
    %20 = vector.load %arg3[%c0_7, %c0_8] : memref<1x32xf32, #tpu.memory_space<vmem>>, vector<1x32xf32>
    %21 = vector.broadcast %20 : vector<1x32xf32> to vector<8x32xf32>
    %22 = arith.addf %19, %21 : vector<8x32xf32>
    %c0_9 = arith.constant 0 : index
    %c0_10 = arith.constant 0 : index
    %23 = vector.load %arg4[%c0_9, %c0_10] : memref<32x128xf32, #tpu.memory_space<vmem>>, vector<32x128xf32>
    %cst_11 = arith.constant dense<0.000000e+00> : vector<8x128xf32>
    %24 = tpu.matmul %22, %23, %cst_11 {dimension_numbers = #tpu.dot_dimension_numbers<[1], [0], [0], [1], [0, 0, 1, 1], [], []>} : vector<8x32xf32>, vector<32x128xf32>, vector<8x128xf32> -> vector<8x128xf32>
    %c0_12 = arith.constant 0 : index
    %c0_13 = arith.constant 0 : index
    %25 = vector.load %arg5[%c0_12, %c0_13] : memref<1x128xf32, #tpu.memory_space<vmem>>, vector<1x128xf32>
    %26 = vector.broadcast %25 : vector<1x128xf32> to vector<8x128xf32>
    %27 = arith.addf %24, %26 : vector<8x128xf32>
    %cst_14 = arith.constant 0.000000e+00 : f32
    %28 = vector.broadcast %cst_14 : f32 to vector<8x128xf32>
    %29 = arith.maximumf %27, %28 : vector<8x128xf32>
    %c0_15 = arith.constant 0 : index
    %c0_16 = arith.constant 0 : index
    %30 = vector.load %arg9[%c0_15, %c0_16] : memref<8x128xf32, #tpu.memory_space<vmem>>, vector<8x128xf32>
    tpu.vector_store %arg9[%c0_15, %c0_16], %29 {strides = array<i32>} : memref<8x128xf32, #tpu.memory_space<vmem>>, vector<8x128xf32>,
    %c0_17 = arith.constant 0 : index
    %c0_18 = arith.constant 0 : index
    %31 = vector.load %arg9[%c0_17, %c0_18] : memref<8x128xf32, #tpu.memory_space<vmem>>, vector<8x128xf32>
    %c0_19 = arith.constant 0 : index
    %c0_20 = arith.constant 0 : index
    %32 = vector.load %arg6[%c0_19, %c0_20] : memref<128x32xf32, #tpu.memory_space<vmem>>, vector<128x32xf32>
    %cst_21 = arith.constant dense<0.000000e+00> : vector<8x32xf32>
    %33 = tpu.matmul %31, %32, %cst_21 {dimension_numbers = #tpu.dot_dimension_numbers<[1], [0], [0], [1], [0, 0, 1, 1], [], []>} : vector<8x128xf32>, vector<128x32xf32>, vector<8x32xf32> -> vector<8x32xf32>
    %c0_22 = arith.constant 0 : index
    %c0_23 = arith.constant 0 : index
    %34 = vector.load %arg7[%c0_22, %c0_23] : memref<1x32xf32, #tpu.memory_space<vmem>>, vector<1x32xf32>
    %35 = vector.broadcast %34 : vector<1x32xf32> to vector<8x32xf32>
    %36 = arith.addf %33, %35 : vector<8x32xf32>
    %37 = arith.addf %36, %0 : vector<8x32xf32>
    %c0_24 = arith.constant 0 : index
    %c0_25 = arith.constant 0 : index
    %38 = vector.load %arg8[%c0_24, %c0_25] : memref<8x32xf32, #tpu.memory_space<vmem>>, vector<8x32xf32>
    tpu.vector_store %arg8[%c0_24, %c0_25], %37 {strides = array<i32>} : memref<8x32xf32, #tpu.memory_space<vmem>>, vector<8x32xf32>,
    return
  }
  func.func @transform_0(%arg0: i32) -> (i32, i32) {
    %c0_i32 = arith.constant 0 : i32
    %c0_i32_0 = arith.constant 0 : i32
    return %arg0, %c0_i32 : i32, i32
  }
  func.func @transform_1(%arg0: i32) -> (i32, i32) {
    %c0_i32 = arith.constant 0 : i32
    %c0_i32_0 = arith.constant 0 : i32
    %c0_i32_1 = arith.constant 0 : i32
    return %c0_i32, %c0_i32_0 : i32, i32
  }
  func.func @transform_2(%arg0: i32) -> (i32, i32) {
    %c0_i32 = arith.constant 0 : i32
    %c0_i32_0 = arith.constant 0 : i32
    %c0_i32_1 = arith.constant 0 : i32
    return %c0_i32, %c0_i32_0 : i32, i32
  }
  func.func @transform_3(%arg0: i32) -> (i32, i32) {
    %c0_i32 = arith.constant 0 : i32
    %c0_i32_0 = arith.constant 0 : i32
    %c0_i32_1 = arith.constant 0 : i32
    return %c0_i32, %c0_i32_0 : i32, i32
  }
  func.func @transform_4(%arg0: i32) -> (i32, i32) {
    %c0_i32 = arith.constant 0 : i32
    %c0_i32_0 = arith.constant 0 : i32
    %c0_i32_1 = arith.constant 0 : i32
    return %c0_i32, %c0_i32_0 : i32, i32
  }
  func.func @transform_5(%arg0: i32) -> (i32, i32) {
    %c0_i32 = arith.constant 0 : i32
    %c0_i32_0 = arith.constant 0 : i32
    %c0_i32_1 = arith.constant 0 : i32
    return %c0_i32, %c0_i32_0 : i32, i32
  }
  func.func @transform_6(%arg0: i32) -> (i32, i32) {
    %c0_i32 = arith.constant 0 : i32
    %c0_i32_0 = arith.constant 0 : i32
    %c0_i32_1 = arith.constant 0 : i32
    return %c0_i32, %c0_i32_0 : i32, i32
  }
  func.func @transform_7(%arg0: i32) -> (i32, i32) {
    %c0_i32 = arith.constant 0 : i32
    %c0_i32_0 = arith.constant 0 : i32
    return %arg0, %c0_i32 : i32, i32
  }
}

</mosaic_0001>

<bundles_post_ra>
// kernel: tpu_custom_call.1
= control target key start
LH: loop header
LB: loop body
LE: loop exit
PB: predicated region body
PF: predicated region fallthrough
CT: control target
= control target key end

     0   :  { %vm28_vm0 = vcmask 261120   ;;  %s512_s0 = inlined_call_operand.vmem [shape: f32[8,32], index: 0, kind: input, shape index: {}]   ;;  %s513_s1 = inlined_call_operand.vmem [shape: f32[1,32], index: 1, kind: input, shape index: {}]   ;;  %s514_s2 = inlined_call_operand.vmem [shape: f32[1,32], index: 2, kind: input, shape index: {}]   ;;  %s515_s3 = inlined_call_operand.vmem [shape: f32[32,128], index: 3, kind: input, shape index: {}]   ;;  %s516_s4 = inlined_call_operand.vmem [shape: f32[1,128], index: 4, kind: input, shape index: {}]   ;;  %s517_s5 = inlined_call_operand.vmem [shape: f32[128,32], index: 5, kind: input, shape index: {}]   ;;  %s518_s6 = inlined_call_operand.vmem [shape: f32[1,32], index: 6, kind: input, shape index: {}]   ;;  %s519_s7 = inlined_call_operand.hbm [shape: f32[8,32], index: 7, kind: output, shape index: {}]  }
   0x1   :  { %v401_v0 = vld [vmem:[%s512_s0] sm:$0xff] }
   0x2   :  { %12 = vsyncpa [#allocation4], 0  ;;  %v29_v1 = vsel %vm28_vm0, %v401_v0, 0.0  ;;  %v62_v7 = vld [vmem:[%s515_s3 + $0x18] sm:$0xff]  ;;  %v355_v8 = vmov 0.0   ;;  %v61_v9 = vld [vmem:[%s515_s3 + $0x10] sm:$0xff] }
   0x3   :  { %30 = vadd.xlane.f32.xlu0 %v29_v1  ;;  %282 = vmatprep.subr.mxu0 %v355_v8  ;;  %vm356_vm1 = vmmov 0   ;;  %v60_v10 = vld [vmem:[%s515_s3 + $0x8] sm:$0xff]  ;;  %v59_v11 = vld [vmem:[%s515_s3] sm:$0xff]  ;;  %v161_v12 = vld [vmem:[%s517_s5 + $0x78] sm:$0xff]  ;;  %s357_s22 = smov [#allocation3]  }
   0x4   :  { %290 = vmatprep.mubr.msk.f32.mxu0 %vm356_vm1, %v355_v8  ;;  %283 = vmatpush3.msra.mxu0 %v62_v7  ;;  %v160_v13 = vld [vmem:[%s517_s5 + $0x70] sm:$0xff]  ;;  %v159_v14 = vld [vmem:[%s517_s5 + $0x68] sm:$0xff]  ;;  %v158_v15 = vld [vmem:[%s517_s5 + $0x60] sm:$0xff]  ;;  %s247_s23 = sshll.u32 %s357_s22, 4  ;;  %s248_s23 = int_to_ptr.vmem [resolvable:$true] %s247_s23 }
   0x5   :  { %293 = vmatprep.subr.mxu1 %v355_v8  ;;  %284 = vmatprep.subr.mxu0 %v355_v8  ;;  %v157_v16 = vld [vmem:[%s517_s5 + $0x58] sm:$0xff]  ;;  %v156_v17 = vld [vmem:[%s517_s5 + $0x50] sm:$0xff]  ;;  %v155_v18 = vld [vmem:[%s517_s5 + $0x48] sm:$0xff]  ;;  %p338_p1 = scmp.lt.s32.totalorder %s248_s23, %s248_s23 }
   0x6   :  { %325 = vmatprep.mubr.msk.f32.mxu1 %vm356_vm1, %v355_v8  ;;  %285 = vmatpush3.msra.mxu0 %v61_v9  ;;  %v154_v19 = vld [vmem:[%s517_s5 + $0x40] sm:$0xff]  ;;  %v153_v20 = vld [vmem:[%s517_s5 + $0x38] sm:$0xff]  ;;  %v152_v21 = vld [vmem:[%s517_s5 + $0x30] sm:$0xff] }
   0x7   :  { %286 = vmatprep.subr.mxu0 %v355_v8  ;;  %294 = vmatpush3.msra.mxu1 %v161_v12  ;;  %v151_v22 = vld [vmem:[%s517_s5 + $0x28] sm:$0xff]  ;;  %v150_v23 = vld [vmem:[%s517_s5 + $0x20] sm:$0xff]  ;;  %v149_v24 = vld [vmem:[%s517_s5 + $0x18] sm:$0xff] }
   0x8   :  { %287 = vmatpush3.msra.mxu0 %v60_v10  ;;  %295 = vmatprep.subr.mxu1 %v355_v8  ;;  %v255_v29 = vld [vmem:[%s513_s1] ss:$0 sm:$0xff]  ;;  %v148_v34 = vld [vmem:[%s517_s5 + $0x10] sm:$0xff]  ;;  %v147_v35 = vld [vmem:[%s517_s5 + $0x8] sm:$0xff] }
   0x9   :  { %288 = vmatprep.subr.mxu0 %v355_v8  ;;  %296 = vmatpush3.msra.mxu1 %v160_v13  ;;  %v256_v31 = vld [vmem:[%s514_s2] ss:$0 sm:$0xff] }
   0xa   :  { %289 = vmatpush3.msra.mxu0 %v59_v11  ;;  %297 = vmatprep.subr.mxu1 %v355_v8  ;;  %v146_v36 = vld [vmem:[%s517_s5] sm:$0xff] }
   0xb   :  { %298 = vmatpush3.msra.mxu1 %v159_v14  ;;  %v257_v37 = vld [vmem:[%s516_s4] ss:$0 sm:$0xff]  ;;  %s333_s4 = scalar_lea.vmem %s248_s23, 128 }
   0xc   :  { %299 = vmatprep.subr.mxu1 %v355_v8  ;;  %v259_v42 = vld [vmem:[%s518_s6] ss:$0 sm:$0xff]  ;;  %p334_p0 = scmp.ne.s32.totalorder %s248_s23, %s333_s4  ;;  %p339_p2 = scmp.lt.s32.totalorder %s333_s4, %s333_s4 }
   0xd   :  { %300 = vmatpush3.msra.mxu1 %v158_v15 }
   0xe   :  { %301 = vmatprep.subr.mxu1 %v355_v8  ;;  %p340_p3 = por %p339_p2, %p338_p1 }
   0xf   :  { %302 = vmatpush3.msra.mxu1 %v157_v16 }
  0x10   :  { %303 = vmatprep.subr.mxu1 %v355_v8  ;;  %p341_p4 = pnand %p340_p3, %p334_p0 }
  0x11   :  { %304 = vmatpush3.msra.mxu1 %v156_v17 }
  0x12   :  { %305 = vmatprep.subr.mxu1 %v355_v8 }
  0x13   :  { %306 = vmatpush3.msra.mxu1 %v155_v18 }
  0x14   :  { %307 = vmatprep.subr.mxu1 %v355_v8 }
  0x15   :  { %308 = vmatpush3.msra.mxu1 %v154_v19 }
  0x16   :  { %309 = vmatprep.subr.mxu1 %v355_v8 }
  0x17   :  { %310 = vmatpush3.msra.mxu1 %v153_v20 }
  0x18   :  { %311 = vmatprep.subr.mxu1 %v355_v8 }
  0x19   :  { %312 = vmatpush3.msra.mxu1 %v152_v21 }
  0x1a   :  { %313 = vmatprep.subr.mxu1 %v355_v8 }
  0x1b   :  { %314 = vmatpush3.msra.mxu1 %v151_v22 }
  0x1c   :  { %315 = vmatprep.subr.mxu1 %v355_v8 }
  0x1d   :  { %316 = vmatpush3.msra.mxu1 %v150_v23 }
  0x1e   :  { %317 = vmatprep.subr.mxu1 %v355_v8 }
  0x1f   :  { %318 = vmatpush3.msra.mxu1 %v149_v24 }
  0x20   :  { %319 = vmatprep.subr.mxu1 %v355_v8 }
  0x21   :  { %320 = vmatpush3.msra.mxu1 %v148_v34 }
  0x22   :  { %321 = vmatprep.subr.mxu1 %v355_v8 }
  0x23   :  { %322 = vmatpush3.msra.mxu1 %v147_v35 }
  0x24   :  { %323 = vmatprep.subr.mxu1 %v355_v8 }
  0x25   :  { %324 = vmatpush3.msra.mxu1 %v146_v36 }
  0x8c   :  { %v31_v2 = vpop.xlane.xlu0 %30 }
  0x8d   :  { %v33_v3 = vmul.f32 0.03125, %v31_v2 }
  0x8f   :  { %v406_v4 = vsub.f32 %v401_v0, %v33_v3 }
  0x91   :  { %v35_v5 = vmul.f32 %v406_v4, %v406_v4 }
  0x93   :  { %v36_v6 = vsel %vm28_vm0, %v35_v5, 0.0 }
  0x94   :  { %37 = vadd.xlane.f32.xlu0 %v36_v6 }
 0x11d   :  { %v38_v25 = vpop.xlane.xlu0 %37 }
 0x11e   :  { %v39_v26 = vmul.f32 0.03125, %v38_v25 }
 0x120   :  { %v40_v27 = vadd.f32 1e-05, %v39_v26 }
 0x122   :  { %331 = vrsqrt.f32 %v40_v27 }
 0x12f   :  { %v332_v28 = vpop.eup %331 }
 0x130   :  { %v42_v30 = vmul.f32 %v332_v28, %v406_v4 }
 0x132   :  { %v50_v32 = vmul.f32 %v255_v29, %v42_v30 }
 0x134   :  { %v58_v33 = vadd.f32 %v256_v31, %v50_v32 }
 0x136   :  { %291 = vmatmul.mubr.msk.f32.vlgmr.msra.gmra.mxu0 %vm28_vm0, %v58_v33 }
 0x1f6   :  { %v139_v38 = vpop.f32.mrf.mxu0 }
 0x1f7   :  { %v140_v39 = vadd.f32 %v257_v37, %v139_v38 }
 0x1f8   :  { %v292_v40 = vpop.f32.mrf.mxu0 }
 0x1f9   :  { %v143_v41 = vmax.f32 %v140_v39, 0.0 }
 0x1fb   :  { %326 = vmatmul.mubr.f32.vlgmr.msra.gmra.mxu1 %v143_v41 }
 0x2bb   :  { %v235_v43 = vpop.f32.mrf.mxu1 }
 0x2bc   :  { %v236_v44 = vadd.f32 %v259_v42, %v235_v43 }
 0x2bd   :  { %v327_v45 = vpop.f32.mrf.mxu1 }
 0x2be   :  { %v239_v46 = vadd.f32 %v236_v44, %v401_v0 }
 0x2c0   :  { %240 = vst.msk [vmem:[#allocation3] sm:$0xff] %vm28_vm0, %v239_v46 }
 0x2c1   :  { %344 = shalt.err (!%p341_p4)
}
 0x2c2   :  { %250 = dma.vmem_to_hbm [thread:$0]  %s248_s23, 128, %s519_s7, [#allocation4]  }
 0x2c3   :  { %353 = dma.done.wait [#allocation4], 128  }
 0x2c4   :  { %354 = vsyncadd [#allocation4], 4294967168 }
 0x2c5   :  { %254 = vsyncpa [#allocation4], 1 }

// kernel: tpu_custom_call.1
= control target key start
LH: loop header
LB: loop body
LE: loop exit
PB: predicated region body
PF: predicated region fallthrough
CT: control target
= control target key end

     0   :  { %vm28_vm0 = vcmask 261120   ;;  %s512_s0 = inlined_call_operand.vmem [shape: f32[8,32], index: 0, kind: input, shape index: {}]   ;;  %s513_s1 = inlined_call_operand.vmem [shape: f32[1,32], index: 1, kind: input, shape index: {}]   ;;  %s514_s2 = inlined_call_operand.vmem [shape: f32[1,32], index: 2, kind: input, shape index: {}]   ;;  %s515_s3 = inlined_call_operand.vmem [shape: f32[32,128], index: 3, kind: input, shape index: {}]   ;;  %s516_s4 = inlined_call_operand.vmem [shape: f32[1,128], index: 4, kind: input, shape index: {}]   ;;  %s517_s5 = inlined_call_operand.vmem [shape: f32[128,32], index: 5, kind: input, shape index: {}]   ;;  %s518_s6 = inlined_call_operand.vmem [shape: f32[1,32], index: 6, kind: input, shape index: {}]   ;;  %s519_s7 = inlined_call_operand.hbm [shape: f32[8,32], index: 7, kind: output, shape index: {}]  }
   0x1   :  { %v401_v0 = vld [vmem:[%s512_s0] sm:$0xff] }
   0x2   :  { %12 = vsyncpa [#allocation4], 0  ;;  %v29_v1 = vsel %vm28_vm0, %v401_v0, 0.0  ;;  %v62_v7 = vld [vmem:[%s515_s3 + $0x18] sm:$0xff]  ;;  %v355_v8 = vmov 0.0   ;;  %v61_v9 = vld [vmem:[%s515_s3 + $0x10] sm:$0xff] }
   0x3   :  { %30 = vadd.xlane.f32.xlu0 %v29_v1  ;;  %282 = vmatprep.subr.mxu0 %v355_v8  ;;  %vm356_vm1 = vmmov 0   ;;  %v60_v10 = vld [vmem:[%s515_s3 + $0x8] sm:$0xff]  ;;  %v59_v11 = vld [vmem:[%s515_s3] sm:$0xff]  ;;  %v161_v12 = vld [vmem:[%s517_s5 + $0x78] sm:$0xff]  ;;  %s357_s22 = smov [#allocation3]  }
   0x4   :  { %290 = vmatprep.mubr.msk.f32.mxu0 %vm356_vm1, %v355_v8  ;;  %283 = vmatpush3.msra.mxu0 %v62_v7  ;;  %v160_v13 = vld [vmem:[%s517_s5 + $0x70] sm:$0xff]  ;;  %v159_v14 = vld [vmem:[%s517_s5 + $0x68] sm:$0xff]  ;;  %v158_v15 = vld [vmem:[%s517_s5 + $0x60] sm:$0xff]  ;;  %s247_s23 = sshll.u32 %s357_s22, 4  ;;  %s248_s23 = int_to_ptr.vmem [resolvable:$true] %s247_s23 }
   0x5   :  { %293 = vmatprep.subr.mxu1 %v355_v8  ;;  %284 = vmatprep.subr.mxu0 %v355_v8  ;;  %v157_v16 = vld [vmem:[%s517_s5 + $0x58] sm:$0xff]  ;;  %v156_v17 = vld [vmem:[%s517_s5 + $0x50] sm:$0xff]  ;;  %v155_v18 = vld [vmem:[%s517_s5 + $0x48] sm:$0xff]  ;;  %p338_p1 = scmp.lt.s32.totalorder %s248_s23, %s248_s23 }
   0x6   :  { %325 = vmatprep.mubr.msk.f32.mxu1 %vm356_vm1, %v355_v8  ;;  %285 = vmatpush3.msra.mxu0 %v61_v9  ;;  %v154_v19 = vld [vmem:[%s517_s5 + $0x40] sm:$0xff]  ;;  %v153_v20 = vld [vmem:[%s517_s5 + $0x38] sm:$0xff]  ;;  %v152_v21 = vld [vmem:[%s517_s5 + $0x30] sm:$0xff] }
   0x7   :  { %286 = vmatprep.subr.mxu0 %v355_v8  ;;  %294 = vmatpush3.msra.mxu1 %v161_v12  ;;  %v151_v22 = vld [vmem:[%s517_s5 + $0x28] sm:$0xff]  ;;  %v150_v23 = vld [vmem:[%s517_s5 + $0x20] sm:$0xff]  ;;  %v149_v24 = vld [vmem:[%s517_s5 + $0x18] sm:$0xff] }
   0x8   :  { %287 = vmatpush3.msra.mxu0 %v60_v10  ;;  %295 = vmatprep.subr.mxu1 %v355_v8  ;;  %v255_v29 = vld [vmem:[%s513_s1] ss:$0 sm:$0xff]  ;;  %v148_v34 = vld [vmem:[%s517_s5 + $0x10] sm:$0xff]  ;;  %v147_v35 = vld [vmem:[%s517_s5 + $0x8] sm:$0xff] }
   0x9   :  { %288 = vmatprep.subr.mxu0 %v355_v8  ;;  %296 = vmatpush3.msra.mxu1 %v160_v13  ;;  %v256_v31 = vld [vmem:[%s514_s2] ss:$0 sm:$0xff] }
   0xa   :  { %289 = vmatpush3.msra.mxu0 %v59_v11  ;;  %297 = vmatprep.subr.mxu1 %v355_v8  ;;  %v146_v36 = vld [vmem:[%s517_s5] sm:$0xff] }
   0xb   :  { %298 = vmatpush3.msra.mxu1 %v159_v14  ;;  %v257_v37 = vld [vmem:[%s516_s4] ss:$0 sm:$0xff]  ;;  %s333_s4 = scalar_lea.vmem %s248_s23, 128 }
   0xc   :  { %299 = vmatprep.subr.mxu1 %v355_v8  ;;  %v259_v42 = vld [vmem:[%s518_s6] ss:$0 sm:$0xff]  ;;  %p334_p0 = scmp.ne.s32.totalorder %s248_s23, %s333_s4  ;;  %p339_p2 = scmp.lt.s32.totalorder %s333_s4, %s333_s4 }
   0xd   :  { %300 = vmatpush3.msra.mxu1 %v158_v15 }
   0xe   :  { %301 = vmatprep.subr.mxu1 %v355_v8  ;;  %p340_p3 = por %p339_p2, %p338_p1 }
   0xf   :  { %302 = vmatpush3.msra.mxu1 %v157_v16 }
  0x10   :  { %303 = vmatprep.subr.mxu1 %v355_v8  ;;  %p341_p4 = pnand %p340_p3, %p334_p0 }
  0x11   :  { %304 = vmatpush3.msra.mxu1 %v156_v17 }
  0x12   :  { %305 = vmatprep.subr.mxu1 %v355_v8 }
  0x13   :  { %306 = vmatpush3.msra.mxu1 %v155_v18 }
  0x14   :  { %307 = vmatprep.subr.mxu1 %v355_v8 }
  0x15   :  { %308 = vmatpush3.msra.mxu1 %v154_v19 }
  0x16   :  { %309 = vmatprep.subr.mxu1 %v355_v8 }
  0x17   :  { %310 = vmatpush3.msra.mxu1 %v153_v20 }
  0x18   :  { %311 = vmatprep.subr.mxu1 %v355_v8 }
  0x19   :  { %312 = vmatpush3.msra.mxu1 %v152_v21 }
  0x1a   :  { %313 = vmatprep.subr.mxu1 %v355_v8 }
  0x1b   :  { %314 = vmatpush3.msra.mxu1 %v151_v22 }
  0x1c   :  { %315 = vmatprep.subr.mxu1 %v355_v8 }
  0x1d   :  { %316 = vmatpush3.msra.mxu1 %v150_v23 }
  0x1e   :  { %317 = vmatprep.subr.mxu1 %v355_v8 }
  0x1f   :  { %318 = vmatpush3.msra.mxu1 %v149_v24 }
  0x20   :  { %319 = vmatprep.subr.mxu1 %v355_v8 }
  0x21   :  { %320 = vmatpush3.msra.mxu1 %v148_v34 }
  0x22   :  { %321 = vmatprep.subr.mxu1 %v355_v8 }
  0x23   :  { %322 = vmatpush3.msra.mxu1 %v147_v35 }
  0x24   :  { %323 = vmatprep.subr.mxu1 %v355_v8 }
  0x25   :  { %324 = vmatpush3.msra.mxu1 %v146_v36 }
  0x8c   :  { %v31_v2 = vpop.xlane.xlu0 %30 }
  0x8d   :  { %v33_v3 = vmul.f32 0.03125, %v31_v2 }
  0x8f   :  { %v406_v4 = vsub.f32 %v401_v0, %v33_v3 }
  0x91   :  { %v35_v5 = vmul.f32 %v406_v4, %v406_v4 }
  0x93   :  { %v36_v6 = vsel %vm28_vm0, %v35_v5, 0.0 }
  0x94   :  { %37 = vadd.xlane.f32.xlu0 %v36_v6 }
 0x11d   :  { %v38_v25 = vpop.xlane.xlu0 %37 }
 0x11e   :  { %v39_v26 = vmul.f32 0.03125, %v38_v25 }
 0x120   :  { %v40_v27 = vadd.f32 1e-05, %v39_v26 }
 0x122   :  { %331 = vrsqrt.f32 %v40_v27 }
 0x12f   :  { %v332_v28 = vpop.eup %331 }
 0x130   :  { %v42_v30 = vmul.f32 %v332_v28, %v406_v4 }
 0x132   :  { %v50_v32 = vmul.f32 %v255_v29, %v42_v30 }
 0x134   :  { %v58_v33 = vadd.f32 %v256_v31, %v50_v32 }
 0x136   :  { %291 = vmatmul.mubr.msk.f32.vlgmr.msra.gmra.mxu0 %vm28_vm0, %v58_v33 }
 0x1f6   :  { %v139_v38 = vpop.f32.mrf.mxu0 }
 0x1f7   :  { %v140_v39 = vadd.f32 %v257_v37, %v139_v38 }
 0x1f8   :  { %v292_v40 = vpop.f32.mrf.mxu0 }
 0x1f9   :  { %v143_v41 = vmax.f32 %v140_v39, 0.0 }
 0x1fb   :  { %326 = vmatmul.mubr.f32.vlgmr.msra.gmra.mxu1 %v143_v41 }
 0x2bb   :  { %v235_v43 = vpop.f32.mrf.mxu1 }
 0x2bc   :  { %v236_v44 = vadd.f32 %v259_v42, %v235_v43 }
 0x2bd   :  { %v327_v45 = vpop.f32.mrf.mxu1 }
 0x2be   :  { %v239_v46 = vadd.f32 %v236_v44, %v401_v0 }
 0x2c0   :  { %240 = vst.msk [vmem:[#allocation3] sm:$0xff] %vm28_vm0, %v239_v46 }
 0x2c1   :  { %344 = shalt.err (!%p341_p4)
}
 0x2c2   :  { %250 = dma.vmem_to_hbm [thread:$0]  %s248_s23, 128, %s519_s7, [#allocation4]  }
 0x2c3   :  { %353 = dma.done.wait [#allocation4], 128  }
 0x2c4   :  { %354 = vsyncadd [#allocation4], 4294967168 }
 0x2c5   :  { %254 = vsyncpa [#allocation4], 1 }

</bundles_post_ra>
